<compile_context>
chip_gen: v7x
topology: tpu7x:2x2x1
jax: 0.10.0
libtpu: 0.0.40
codegen_flags: <defaults>
</compile_context>

<pallas_src>
import functools

import jax
import jax.numpy as jnp
from jax.experimental import pallas as pl
from jax.experimental.pallas import tpu as pltpu


_LANES = 128

# Per-generation logits bytes per block (real data) and scoped-VMEM limit.
_TARGET_TILE_BYTES = {"v5e": 4 << 20, "v6e": 8 << 20, "v7x": 4 << 20,
                      "other": 4 << 20}
_VMEM_LIMIT_BYTES = {"v5e": 64 << 20, "v6e": 64 << 20, "v7x": 48 << 20,
                     "other": 48 << 20}


def _tpu_generation():
    try:
        kind = jax.devices()[0].device_kind.lower()
    except Exception:
        return "other"
    if "v5 lite" in kind or "v5e" in kind or "v5lite" in kind:
        return "v5e"
    if "v6" in kind:
        return "v6e"
    if "7" in kind:
        return "v7x"
    return "other"


def _choose_block_rows(r_pad, c, itemsize, target_bytes):
    """Rows (of 128 samples) per block so the logits tile is ~target_bytes."""
    per_row = max(1, c * _LANES * itemsize)
    tr = max(8, (target_bytes // per_row) // 8 * 8)
    tr = min(tr, 1 << 15)                      # hard cap: 4M samples / block
    if r_pad <= tr:
        return int(r_pad)                      # single full-extent block
    return int(tr)


def _focal_loss_kernel(pred_ref, label_ref, out_ref, acc_ref, *,
                       num_classes, alpha, gamma, n_total,
                       block_rows, lanes, blocks_per_partial, last_real_block):
    p = pl.program_id(0)                       # partial (core) index
    i = pl.program_id(1)                       # block index within partial
    blk = p * blocks_per_partial + i           # global block index

    @pl.when(i == 0)
    def _():
        acc_ref[...] = jnp.zeros_like(acc_ref)

    labels = label_ref[...].astype(jnp.int32)              # (TR, S)

    # Pass 1: max over classes.  Classes live on the leading untiled axis, so
    # this is C-1 dense elementwise maxes over (TR, S) -- no cross-lane work.
    m = pred_ref[0].astype(jnp.float32)
    for cl in range(1, num_classes):
        m = jnp.maximum(m, pred_ref[cl].astype(jnp.float32))

    # Pass 2: softmax denominator + select of the target-class shifted logit.
    denom = jnp.zeros_like(m)
    z_t = jnp.zeros_like(m)
    for cl in range(num_classes):
        z_c = pred_ref[cl].astype(jnp.float32) - m
        denom = denom + jnp.exp(z_c)
        z_t = jnp.where(labels == cl, z_c, z_t)

    logp_t = z_t - jnp.log(denom)              # log p_t   (TR, S)
    p_t = jnp.exp(logp_t)                      # p_t       (TR, S)

    # alpha vector is [alpha] + [1-alpha]*(C-1) by construction.
    alpha_t = jnp.where(labels == 0, alpha, 1.0 - alpha)

    one_minus = jnp.maximum(1.0 - p_t, 0.0)    # clamp fp round-off
    g = float(gamma)
    if g == int(g) and g >= 0:                 # integer gamma: repeated mul
        focal = jnp.ones_like(one_minus)
        for _ in range(int(g)):
            focal = focal * one_minus
    else:                                      # general float gamma
        focal = jnp.exp(g * jnp.log(one_minus))

    loss = -alpha_t * focal * logp_t           # per-sample loss (TR, S)

    # Blocks strictly before the last real block are guaranteed fully valid:
    # accumulate with no mask.  Only tail / ghost blocks pay for the
    # iota+compare+select (select-based masking: NaN in padded data is safe).
    full_block = blk < last_real_block

    @pl.when(full_block)
    def _():
        acc_ref[...] += loss

    @pl.when(jnp.logical_not(full_block))
    def _():
        r_ids = jax.lax.broadcasted_iota(jnp.int32, (block_rows, lanes), 0)
        s_ids = jax.lax.broadcasted_iota(jnp.int32, (block_rows, lanes), 1)
        gidx = (blk * block_rows + r_ids) * lanes + s_ids
        acc_ref[...] += jnp.where(gidx < n_total, loss, 0.0)

    @pl.when(i == blocks_per_partial - 1)
    def _():
        total = jnp.sum(acc_ref[...], keepdims=True)       # (1, 1)
        out_ref[...] = total.reshape(1, 1, 1)


def focal_loss(y_pred, y_true, num_classes, alpha=0.25, gamma=2,
               size_average=True, block_rows=None, num_partials=None):
    """Pallas equivalent of FocalLoss(num_classes, alpha, gamma, size_average)."""
    n, c = y_pred.shape
    assert c == num_classes

    gen = _tpu_generation()
    itemsize = jnp.dtype(y_pred.dtype).itemsize

    n_pad = pl.cdiv(n, _LANES) * _LANES
    r_pad = n_pad // _LANES

    # (N, C) -> (C, N): one materialized XLA pass (pad fuses into it).
    # TODO(synk): eliminate this transpose for small C (interleaved-lane read
    # + XLU deinterleave, or allow_input_fusion); it is the remaining extra
    # HBM read+write of the dominant tensor on this bandwidth-bound kernel.
    pred_t = jnp.transpose(y_pred)
    labels = y_true
    if n_pad != n:
        pred_t = jnp.pad(pred_t, ((0, 0), (0, n_pad - n)))   # zero logits
        labels = jnp.pad(labels, (0, n_pad - n))              # zero labels
    pred3 = pred_t.reshape(c, r_pad, _LANES)      # free reshape
    labels2 = labels.reshape(r_pad, _LANES)       # caller's int dtype kept

    if block_rows is None:
        tr = _choose_block_rows(r_pad, c, itemsize, _TARGET_TILE_BYTES[gen])
    else:
        tr = min(int(block_rows), r_pad)
        if tr < r_pad:
            tr = max(8, (tr // 8) * 8)
    nblocks = pl.cdiv(r_pad, tr)

    if num_partials is None:
        num_partials = 2 if gen == "v7x" else 1   # v7x: one partial per TC
    P = int(max(1, min(num_partials, nblocks)))
    nb_pp = int(pl.cdiv(nblocks, P))

    # Clamp ghost block indices (when nblocks % P != 0) so no DMA ever goes
    # out of bounds; their contribution is zeroed by the in-kernel mask.
    def pred_map(p, i):
        return (0, jnp.minimum(p * nb_pp + i, nblocks - 1), 0)

    def label_map(p, i):
        return (jnp.minimum(p * nb_pp + i, nblocks - 1), 0)

    kernel = functools.partial(
        _focal_loss_kernel, num_classes=c, alpha=float(alpha), gamma=gamma,
        n_total=n, block_rows=tr, lanes=_LANES,
        blocks_per_partial=nb_pp, last_real_block=int(nblocks - 1))

    cost = pl.CostEstimate(
        flops=int(12 * n * c),
        transcendentals=int(n * c + 3 * n),
        bytes_accessed=int(n_pad * c * itemsize
                           + n_pad * jnp.dtype(y_true.dtype).itemsize + 4 * P))

    partials = pl.pallas_call(
        kernel,
        out_shape=jax.ShapeDtypeStruct((P, 1, 1), jnp.float32),
        grid_spec=pltpu.PrefetchScalarGridSpec(
            num_scalar_prefetch=0,
            grid=(P, nb_pp),
            in_specs=[
                pl.BlockSpec((c, tr, _LANES), pred_map),     # logits block
                pl.BlockSpec((tr, _LANES), label_map),       # labels block
            ],
            out_specs=pl.BlockSpec((1, 1, 1), lambda p, i: (p, 0, 0)),
            scratch_shapes=[pltpu.VMEM((tr, _LANES), jnp.float32)],
        ),
        compiler_params=pltpu.CompilerParams(
            dimension_semantics=("parallel", "arbitrary"),
            vmem_limit_bytes=_VMEM_LIMIT_BYTES[gen]),
        cost_estimate=cost,
    )(pred3, labels2)

    total = jnp.sum(partials)
    return total / float(n) if size_average else total


def _focal_loss_ref(y_pred, y_true, num_classes, alpha=0.25, gamma=2,
                    size_average=True):
    """Pure-JAX reference mirroring the torch forward exactly."""
    alpha_vec = jnp.array([alpha] + [1.0 - alpha] * (num_classes - 1),
                          dtype=jnp.float32)
    p = jax.nn.softmax(y_pred.astype(jnp.float32), axis=1)
    logp = jnp.log(p)
    idx = y_true.astype(jnp.int32)
    p_t = jnp.take_along_axis(p, idx[:, None], axis=1)[:, 0]
    logp_t = jnp.take_along_axis(logp, idx[:, None], axis=1)[:, 0]
    a_t = alpha_vec[idx]
    loss = a_t * (-jnp.power(1.0 - p_t, gamma) * logp_t)
    return jnp.mean(loss) if size_average else jnp.sum(loss)


if __name__ == "__main__":
    key = jax.random.PRNGKey(0)
    k1, k2, k3, k4, k5, k6 = jax.random.split(key, 6)

    # 1) tiny shape matching the module's (batch, num_classes) input
    N, C = 8, 4
    y_pred = jax.random.normal(k1, (N, C), dtype=jnp.float32)
    y_true = jax.random.randint(k2, (N,), 0, C, dtype=jnp.int32)
    loss = focal_loss(y_pred, y_true, num_classes=C, alpha=0.25, gamma=2,
                      size_average=True)
    jax.block_until_ready(loss)
    ref = _focal_loss_ref(y_pred, y_true, C)
    assert jnp.allclose(loss, ref, rtol=2e-4, atol=1e-5), (loss, ref)

    # 2) ragged N (wrapper zero-pad path), non-integer gamma, sum reduction
    N2, C2 = 300, 4
    y_pred2 = jax.random.normal(k3, (N2, C2), dtype=jnp.float32)
    y_true2 = jax.random.randint(k4, (N2,), 0, C2, dtype=jnp.int32)
    for sz_avg, gmm in ((True, 2), (False, 1.5)):
        got = focal_loss(y_pred2, y_true2, C2, gamma=gmm, size_average=sz_avg)
        jax.block_until_ready(got)
        want = _focal_loss_ref(y_pred2, y_true2, C2, gamma=gmm,
                               size_average=sz_avg)
        assert jnp.allclose(got, want, rtol=2e-4, atol=1e-5), \
            (sz_avg, gmm, got, want)

    # 3) multi-block grid, forced 2 partial sums (v7x-style split, runs
    #    sequentially on 1-TC chips), ghost-block masking, int8 labels
    N3, C3 = 12288, 4
    y_pred3 = jax.random.normal(k5, (N3, C3), dtype=jnp.float32)
    y_true3 = jax.random.randint(k6, (N3,), 0, C3, dtype=jnp.int32)
    got = focal_loss(y_pred3, y_true3.astype(jnp.int8), C3,
                     block_rows=32, num_partials=2, size_average=True)
    jax.block_until_ready(got)
    want = _focal_loss_ref(y_pred3, y_true3, C3, size_average=True)
    assert jnp.allclose(got, want, rtol=2e-4, atol=1e-5), (got, want)

    # 4) bf16 logits (kernel upcasts to f32 internally), sum reduction
    got = focal_loss(y_pred3.astype(jnp.bfloat16), y_true3, C3,
                     size_average=False)
    jax.block_until_ready(got)
    want = _focal_loss_ref(y_pred3.astype(jnp.bfloat16), y_true3, C3,
                           size_average=False)
    assert jnp.allclose(got, want, rtol=1e-3, atol=1e-3), (got, want)

    print("KERNEL_OK")
</pallas_src>

<mosaic_0001>
module attributes {stable_mosaic.version = 11 : i64} {
  func.func @_focal_loss_kernel(%arg0: i32, %arg1: i32, %arg2: memref<4x1x128xf32, #tpu.memory_space<vmem>>, %arg3: memref<1x128xi32, #tpu.memory_space<vmem>>, %arg4: memref<1x1x1xf32, #tpu.memory_space<vmem>>, %arg5: memref<1x128xf32, #tpu.memory_space<vmem>>) attributes {dimension_semantics = [#tpu.dimension_semantics<parallel>, #tpu.dimension_semantics<arbitrary>], iteration_bounds = array<i64: 1, 1>, scalar_prefetch = 0 : i64, scratch_operands = 1 : i64, tpu.core_type = #tpu.core_type<tc>, window_params = [{transform_indices = @transform_0, window_bounds = array<i64: 4, 1, 128>}, {transform_indices = @transform_1, window_bounds = array<i64: 1, 128>}, {transform_indices = @transform_2, window_bounds = array<i64: 1, 1, 1>}]} {
    %c1_i32 = arith.constant 1 : i32
    %0 = arith.muli %arg0, %c1_i32 : i32
    %1 = arith.addi %0, %arg1 : i32
    %c0_i32 = arith.constant 0 : i32
    %2 = arith.cmpi eq, %arg1, %c0_i32 : i32
    %3 = arith.extui %2 : i1 to i32
    %c0_i32_0 = arith.constant 0 : i32
    %4 = arith.cmpi ne, %3, %c0_i32_0 : i32
    scf.if %4 {
      %cst_38 = arith.constant 0.000000e+00 : f32
      %79 = vector.broadcast %cst_38 : f32 to vector<1x128xf32>
      %c0_39 = arith.constant 0 : index
      %c0_40 = arith.constant 0 : index
      %80 = vector.load %arg5[%c0_39, %c0_40] : memref<1x128xf32, #tpu.memory_space<vmem>>, vector<1x128xf32>
      tpu.vector_store %arg5[%c0_39, %c0_40], %79 {strides = array<i32>} : memref<1x128xf32, #tpu.memory_space<vmem>>, vector<1x128xf32>,
    } else {
    }
    %c0 = arith.constant 0 : index
    %c0_1 = arith.constant 0 : index
    %5 = vector.load %arg3[%c0, %c0_1] : memref<1x128xi32, #tpu.memory_space<vmem>>, vector<1x128xi32>
    %c0_2 = arith.constant 0 : index
    %c0_3 = arith.constant 0 : index
    %c0_4 = arith.constant 0 : index
    %6 = vector.load %arg2[%c0_2, %c0_3, %c0_4] : memref<4x1x128xf32, #tpu.memory_space<vmem>>, vector<1x1x128xf32>
    %7 = vector.shape_cast %6 : vector<1x1x128xf32> to vector<1x128xf32>
    %c1 = arith.constant 1 : index
    %c0_5 = arith.constant 0 : index
    %c0_6 = arith.constant 0 : index
    %8 = vector.load %arg2[%c1, %c0_5, %c0_6] : memref<4x1x128xf32, #tpu.memory_space<vmem>>, vector<1x1x128xf32>
    %9 = vector.shape_cast %8 : vector<1x1x128xf32> to vector<1x128xf32>
    %10 = arith.maximumf %7, %9 : vector<1x128xf32>
    %c2 = arith.constant 2 : index
    %c0_7 = arith.constant 0 : index
    %c0_8 = arith.constant 0 : index
    %11 = vector.load %arg2[%c2, %c0_7, %c0_8] : memref<4x1x128xf32, #tpu.memory_space<vmem>>, vector<1x1x128xf32>
    %12 = vector.shape_cast %11 : vector<1x1x128xf32> to vector<1x128xf32>
    %13 = arith.maximumf %10, %12 : vector<1x128xf32>
    %c3 = arith.constant 3 : index
    %c0_9 = arith.constant 0 : index
    %c0_10 = arith.constant 0 : index
    %14 = vector.load %arg2[%c3, %c0_9, %c0_10] : memref<4x1x128xf32, #tpu.memory_space<vmem>>, vector<1x1x128xf32>
    %15 = vector.shape_cast %14 : vector<1x1x128xf32> to vector<1x128xf32>
    %16 = arith.maximumf %13, %15 : vector<1x128xf32>
    %cst = arith.constant 0.000000e+00 : f32
    %17 = vector.broadcast %cst : f32 to vector<1x128xf32>
    %cst_11 = arith.constant 0.000000e+00 : f32
    %18 = vector.broadcast %cst_11 : f32 to vector<1x128xf32>
    %c0_12 = arith.constant 0 : index
    %c0_13 = arith.constant 0 : index
    %c0_14 = arith.constant 0 : index
    %19 = vector.load %arg2[%c0_12, %c0_13, %c0_14] : memref<4x1x128xf32, #tpu.memory_space<vmem>>, vector<1x1x128xf32>
    %20 = vector.shape_cast %19 : vector<1x1x128xf32> to vector<1x128xf32>
    %21 = arith.subf %20, %16 : vector<1x128xf32>
    %22 = math.exp %21 : vector<1x128xf32>
    %23 = arith.addf %17, %22 : vector<1x128xf32>
    %c0_i32_15 = arith.constant 0 : i32
    %24 = vector.broadcast %c0_i32_15 : i32 to vector<1x128xi32>
    %25 = arith.cmpi eq, %5, %24 : vector<1x128xi32>
    %26 = arith.select %25, %21, %18 : vector<1x128xi1>, vector<1x128xf32>
    %c1_16 = arith.constant 1 : index
    %c0_17 = arith.constant 0 : index
    %c0_18 = arith.constant 0 : index
    %27 = vector.load %arg2[%c1_16, %c0_17, %c0_18] : memref<4x1x128xf32, #tpu.memory_space<vmem>>, vector<1x1x128xf32>
    %28 = vector.shape_cast %27 : vector<1x1x128xf32> to vector<1x128xf32>
    %29 = arith.subf %28, %16 : vector<1x128xf32>
    %30 = math.exp %29 : vector<1x128xf32>
    %31 = arith.addf %23, %30 : vector<1x128xf32>
    %c1_i32_19 = arith.constant 1 : i32
    %32 = vector.broadcast %c1_i32_19 : i32 to vector<1x128xi32>
    %33 = arith.cmpi eq, %5, %32 : vector<1x128xi32>
    %34 = arith.select %33, %29, %26 : vector<1x128xi1>, vector<1x128xf32>
    %c2_20 = arith.constant 2 : index
    %c0_21 = arith.constant 0 : index
    %c0_22 = arith.constant 0 : index
    %35 = vector.load %arg2[%c2_20, %c0_21, %c0_22] : memref<4x1x128xf32, #tpu.memory_space<vmem>>, vector<1x1x128xf32>
    %36 = vector.shape_cast %35 : vector<1x1x128xf32> to vector<1x128xf32>
    %37 = arith.subf %36, %16 : vector<1x128xf32>
    %38 = math.exp %37 : vector<1x128xf32>
    %39 = arith.addf %31, %38 : vector<1x128xf32>
    %c2_i32 = arith.constant 2 : i32
    %40 = vector.broadcast %c2_i32 : i32 to vector<1x128xi32>
    %41 = arith.cmpi eq, %5, %40 : vector<1x128xi32>
    %42 = arith.select %41, %37, %34 : vector<1x128xi1>, vector<1x128xf32>
    %c3_23 = arith.constant 3 : index
    %c0_24 = arith.constant 0 : index
    %c0_25 = arith.constant 0 : index
    %43 = vector.load %arg2[%c3_23, %c0_24, %c0_25] : memref<4x1x128xf32, #tpu.memory_space<vmem>>, vector<1x1x128xf32>
    %44 = vector.shape_cast %43 : vector<1x1x128xf32> to vector<1x128xf32>
    %45 = arith.subf %44, %16 : vector<1x128xf32>
    %46 = math.exp %45 : vector<1x128xf32>
    %47 = arith.addf %39, %46 : vector<1x128xf32>
    %c3_i32 = arith.constant 3 : i32
    %48 = vector.broadcast %c3_i32 : i32 to vector<1x128xi32>
    %49 = arith.cmpi eq, %5, %48 : vector<1x128xi32>
    %50 = arith.select %49, %45, %42 : vector<1x128xi1>, vector<1x128xf32>
    %51 = math.log %47 : vector<1x128xf32>
    %52 = arith.subf %50, %51 : vector<1x128xf32>
    %53 = math.exp %52 : vector<1x128xf32>
    %c0_i32_26 = arith.constant 0 : i32
    %54 = vector.broadcast %c0_i32_26 : i32 to vector<1x128xi32>
    %55 = arith.cmpi eq, %5, %54 : vector<1x128xi32>
    %cst_27 = arith.constant 2.500000e-01 : f32
    %cst_28 = arith.constant 7.500000e-01 : f32
    %56 = vector.broadcast %cst_27 : f32 to vector<1x128xf32>
    %57 = vector.broadcast %cst_28 : f32 to vector<1x128xf32>
    %58 = arith.select %55, %56, %57 : vector<1x128xi1>, vector<1x128xf32>
    %cst_29 = arith.constant 1.000000e+00 : f32
    %59 = vector.broadcast %cst_29 : f32 to vector<1x128xf32>
    %60 = arith.subf %59, %53 : vector<1x128xf32>
    %cst_30 = arith.constant 0.000000e+00 : f32
    %61 = vector.broadcast %cst_30 : f32 to vector<1x128xf32>
    %62 = arith.maximumf %60, %61 : vector<1x128xf32>
    %cst_31 = arith.constant 1.000000e+00 : f32
    %63 = vector.broadcast %cst_31 : f32 to vector<1x128xf32>
    %64 = arith.mulf %63, %62 : vector<1x128xf32>
    %65 = arith.mulf %64, %62 : vector<1x128xf32>
    %cst_32 = arith.constant 0.000000e+00 : f32
    %66 = vector.broadcast %cst_32 : f32 to vector<1x128xf32>
    %67 = arith.subf %66, %58 : vector<1x128xf32>
    %68 = arith.mulf %67, %65 : vector<1x128xf32>
    %69 = arith.mulf %68, %52 : vector<1x128xf32>
    %c0_i32_33 = arith.constant 0 : i32
    %70 = arith.cmpi slt, %1, %c0_i32_33 : i32
    %71 = arith.extui %70 : i1 to i32
    %c0_i32_34 = arith.constant 0 : i32
    %72 = arith.cmpi ne, %71, %c0_i32_34 : i32
    scf.if %72 {
      %c0_38 = arith.constant 0 : index
      %c0_39 = arith.constant 0 : index
      %79 = vector.load %arg5[%c0_38, %c0_39] : memref<1x128xf32, #tpu.memory_space<vmem>>, vector<1x128xf32>
      %80 = arith.addf %79, %69 : vector<1x128xf32>
      %c0_40 = arith.constant 0 : index
      %c0_41 = arith.constant 0 : index
      %81 = vector.load %arg5[%c0_40, %c0_41] : memref<1x128xf32, #tpu.memory_space<vmem>>, vector<1x128xf32>
      tpu.vector_store %arg5[%c0_40, %c0_41], %80 {strides = array<i32>} : memref<1x128xf32, #tpu.memory_space<vmem>>, vector<1x128xf32>,
    } else {
    }
    %true = arith.constant true
    %73 = arith.xori %70, %true : i1
    %74 = arith.extui %73 : i1 to i32
    %c0_i32_35 = arith.constant 0 : i32
    %75 = arith.cmpi ne, %74, %c0_i32_35 : i32
    scf.if %75 {
      %79 = tpu.iota {dimensions = array<i32: 0>} : vector<1x128xi32>
      %80 = tpu.iota {dimensions = array<i32: 1>} : vector<1x128xi32>
      %c1_i32_38 = arith.constant 1 : i32
      %81 = arith.muli %1, %c1_i32_38 : i32
      %82 = vector.broadcast %81 : i32 to vector<1x128xi32>
      %83 = arith.addi %82, %79 : vector<1x128xi32>
      %c128_i32 = arith.constant 128 : i32
      %84 = vector.broadcast %c128_i32 : i32 to vector<1x128xi32>
      %85 = arith.muli %83, %84 : vector<1x128xi32>
      %86 = arith.addi %85, %80 : vector<1x128xi32>
      %c0_39 = arith.constant 0 : index
      %c0_40 = arith.constant 0 : index
      %87 = vector.load %arg5[%c0_39, %c0_40] : memref<1x128xf32, #tpu.memory_space<vmem>>, vector<1x128xf32>
      %c8_i32 = arith.constant 8 : i32
      %88 = vector.broadcast %c8_i32 : i32 to vector<1x128xi32>
      %89 = arith.cmpi slt, %86, %88 : vector<1x128xi32>
      %cst_41 = arith.constant 0.000000e+00 : f32
      %90 = vector.broadcast %cst_41 : f32 to vector<1x128xf32>
      %91 = arith.select %89, %69, %90 : vector<1x128xi1>, vector<1x128xf32>
      %92 = arith.addf %87, %91 : vector<1x128xf32>
      %c0_42 = arith.constant 0 : index
      %c0_43 = arith.constant 0 : index
      %93 = vector.load %arg5[%c0_42, %c0_43] : memref<1x128xf32, #tpu.memory_space<vmem>>, vector<1x128xf32>
      tpu.vector_store %arg5[%c0_42, %c0_43], %92 {strides = array<i32>} : memref<1x128xf32, #tpu.memory_space<vmem>>, vector<1x128xf32>,
    } else {
    }
    %c0_i32_36 = arith.constant 0 : i32
    %76 = arith.cmpi eq, %arg1, %c0_i32_36 : i32
    %77 = arith.extui %76 : i1 to i32
    %c0_i32_37 = arith.constant 0 : i32
    %78 = arith.cmpi ne, %77, %c0_i32_37 : i32
    scf.if %78 {
      %c0_38 = arith.constant 0 : index
      %c0_39 = arith.constant 0 : index
      %79 = vector.load %arg5[%c0_38, %c0_39] : memref<1x128xf32, #tpu.memory_space<vmem>>, vector<1x128xf32>
      %80 = vector.shape_cast %79 : vector<1x128xf32> to vector<1x1x128xf32>
      %cst_40 = arith.constant dense<0.000000e+00> : vector<1xf32>
      %81 = vector.multi_reduction <add>, %80, %cst_40 [1, 2] : vector<1x1x128xf32> to vector<1xf32>
      %82 = vector.shape_cast %81 : vector<1xf32> to vector<1x1x1xf32>
      %83 = vector.extract %82[0, 0, 0] : f32 from vector<1x1x1xf32>
      %84 = vector.broadcast %83 : f32 to vector<1x1xf32>
      %85 = vector.shape_cast %84 : vector<1x1xf32> to vector<1x1x1xf32>
      %c0_41 = arith.constant 0 : index
      %c0_42 = arith.constant 0 : index
      %c0_43 = arith.constant 0 : index
      %86 = vector.load %arg4[%c0_41, %c0_42, %c0_43] : memref<1x1x1xf32, #tpu.memory_space<vmem>>, vector<1x1x1xf32>
      tpu.vector_store %arg4[%c0_41, %c0_42, %c0_43], %85 {strides = array<i32>} : memref<1x1x1xf32, #tpu.memory_space<vmem>>, vector<1x1x1xf32>,
    } else {
    }
    return
  }
  func.func @transform_0(%arg0: i32, %arg1: i32) -> (i32, i32, i32) {
    %c1_i32 = arith.constant 1 : i32
    %0 = arith.muli %arg0, %c1_i32 : i32
    %1 = arith.addi %0, %arg1 : i32
    %c0_i32 = arith.constant 0 : i32
    %2 = arith.minsi %1, %c0_i32 : i32
    %c0_i32_0 = arith.constant 0 : i32
    %c0_i32_1 = arith.constant 0 : i32
    %c0_i32_2 = arith.constant 0 : i32
    return %c0_i32_0, %2, %c0_i32_1 : i32, i32, i32
  }
  func.func @transform_1(%arg0: i32, %arg1: i32) -> (i32, i32) {
    %c1_i32 = arith.constant 1 : i32
    %0 = arith.muli %arg0, %c1_i32 : i32
    %1 = arith.addi %0, %arg1 : i32
    %c0_i32 = arith.constant 0 : i32
    %2 = arith.minsi %1, %c0_i32 : i32
    %c0_i32_0 = arith.constant 0 : i32
    %c0_i32_1 = arith.constant 0 : i32
    return %2, %c0_i32_0 : i32, i32
  }
  func.func @transform_2(%arg0: i32, %arg1: i32) -> (i32, i32, i32) {
    %c0_i32 = arith.constant 0 : i32
    %c0_i32_0 = arith.constant 0 : i32
    %c0_i32_1 = arith.constant 0 : i32
    return %arg0, %c0_i32, %c0_i32_0 : i32, i32, i32
  }
}

</mosaic_0001>

<bundles_post_ra>
// kernel: tpu_custom_call.1
= control target key start
LH: loop header
LB: loop body
LE: loop exit
PB: predicated region body
PF: predicated region fallthrough
CT: control target
= control target key end

     0   :  { %7 = vsyncpa [#allocation4], 0  ;;  %s291_s0 = inlined_call_operand.hbm [shape: f32[4,1,128], index: 0, kind: input, shape index: {}]   ;;  %s292_s1 = inlined_call_operand.vmem [shape: s32[1,128], index: 1, kind: input, shape index: {}]   ;;  %s293_s2 = inlined_call_operand.hbm [shape: f32[1,1,1], index: 2, kind: output, shape index: {}]  }
   0x1   :  { %8 = vsyncpa [#allocation5], 0  ;;  %s241_s9 = smov [#allocation3]   ;;  %s193_s13 = scalar_lea.hbm %s291_s0, 64 }
   0x2   :  { %s19_s10 = sshll.u32 %s241_s9, 4  ;;  %p194_p0 = scmp.ne.s32.totalorder %s291_s0, %s193_s13  ;;  %s20_s10 = int_to_ptr.vmem [resolvable:$true] %s19_s10 }
   0x3   :  { %p197_p1 = scmp.lt.u32.totalorder %s193_s13, %s291_s0 }
   0x5   :  { %p199_p2 = pnand %p197_p1, %p194_p0 }
   0x7   :  { %202 = shalt.err (!%p199_p2)
}
   0x8   :  { %s203_s18 = scalar_lea.vmem %s20_s10, 64  ;;  %p208_p4 = scmp.lt.s32.totalorder %s20_s10, %s20_s10 }
   0x9   :  { %p204_p3 = scmp.ne.s32.totalorder %s20_s10, %s203_s18  ;;  %p209_p5 = scmp.lt.s32.totalorder %s203_s18, %s203_s18 }
   0xb   :  { %p210_p6 = por %p209_p5, %p208_p4 }
   0xd   :  { %p211_p7 = pnand %p210_p6, %p204_p3 }
   0xf   :  { %214 = shalt.err (!%p211_p7)
}
  0x10   :  { %s242_s19 = smov 16   ;;  %s243_s20 = smov 1  }
  0x11   :  { %25 = dma.hbm_to_vmem [thread:$0]  %s291_s0, 64, %s20_s10, [#allocation4], %s242_s19, %s242_s19, %s243_s20  }
  0x12   :  { %237 = dma.done.wait [#allocation4], 64  }
  0x13   :  { %238 = vsyncadd [#allocation4], 4294967232  ;;  %v244_v0 = vmov 0.0   ;;  %v65_v1 = vld [vmem:[#allocation3] sm:$0x1]  ;;  %v122_v32 = vlaneseq  ;;  %v245_v35 = vmov 0.75  }
  0x14   :  { %63 = vst [vmem:[#allocation2] sm:$0x1] %v244_v0  ;;  %v67_v2 = vld [vmem:[#allocation3 + $0x1] sm:$0x1]  ;;  %v70_v4 = vld [vmem:[#allocation3 + $0x2] sm:$0x1] }
  0x15   :  { %v68_v3 = vmax.f32 %v65_v1, %v67_v2  ;;  %v73_v5 = vld [vmem:[#allocation3 + $0x3] sm:$0x1]  ;;  %v64_v21 = vld [vmem:[%s292_s1] sm:$0x1]  ;;  %v123_v33 = vshrl.u32 %v122_v32, 7  ;;  %v125_v37 = vand.u32 127, %v122_v32 }
  0x16   :  { %vm79_vm0 = vcmp.eq.s32.totalorder %v64_v21, 0  ;;  %vm85_vm1 = vcmp.eq.s32.totalorder %v64_v21, 1  ;;  %vm91_vm2 = vcmp.eq.s32.totalorder %v64_v21, 2  ;;  %vm97_vm3 = vcmp.eq.s32.totalorder %v64_v21, 3  ;;  %s246_s1 = smov [#allocation6]  }
  0x17   :  { %v71_v6 = vmax.f32 %v68_v3, %v70_v4  ;;  %v104_v36 = vsel %vm79_vm0, 0.25, %v245_v35  ;;  %v128_v38 = vmul.u32 128, %v123_v33  ;;  %vm139_vm5 = vcmask 1040384   ;;  %s159_s24 = sshll.u32 %s246_s1, 4  ;;  %s160_s24 = int_to_ptr.vmem [resolvable:$true] %s159_s24 }
  0x18   :  { %v108_v41 = vsub.f32 0.0, %v104_v36  ;;  %vm151_vm6 = vcmask 0   ;;  %s215_s26 = scalar_lea.vmem %s160_s24, 16  ;;  %s219_s27 = scalar_lea.vmem %s160_s24, 32 }
  0x19   :  { %v74_v7 = vmax.f32 %v71_v6, %v73_v5  ;;  %v129_v42 = vadd.s32 %v128_v38, %v125_v37  ;;  %p216_p8 = scmp.ne.s32.totalorder %s160_s24, %s215_s26  ;;  %p220_p9 = scmp.lt.s32.totalorder %s160_s24, %s160_s24 }
  0x1a   :  { %p221_p10 = scmp.lt.s32.totalorder %s219_s27, %s215_s26 }
  0x1b   :  { %v75_v8 = vsub.f32 %v65_v1, %v74_v7  ;;  %v81_v9 = vsub.f32 %v67_v2, %v74_v7  ;;  %v87_v10 = vsub.f32 %v70_v4, %v74_v7  ;;  %v93_v11 = vsub.f32 %v73_v5, %v74_v7  ;;  %v130_v46 = vld [vmem:[#allocation2] sm:$0x1] }
  0x1c   :  { %vm131_vm4 = vcmp.lt.s32.totalorder %v129_v42, 8  ;;  %p222_p11 = por %p221_p10, %p220_p9 }
  0x1d   :  { %v76_v12 = vmul.f32 1.442695, %v75_v8  ;;  %v82_v13 = vmul.f32 1.442695, %v81_v9  ;;  %v88_v14 = vmul.f32 1.442695, %v87_v10 }
  0x1e   :  { %v94_v15 = vmul.f32 1.442695, %v93_v11  ;;  %v80_v24 = vsel %vm79_vm0, %v75_v8, 0.0  ;;  %p223_p12 = pnand %p222_p11, %p216_p8 }
  0x1f   :  { %181 = vpow2.f32 %v76_v12  ;;  %v86_v25 = vsel %vm85_vm1, %v81_v9, %v80_v24 }
  0x20   :  { %183 = vpow2.f32 %v82_v13  ;;  %v92_v26 = vsel %vm91_vm2, %v87_v10, %v86_v25 }
  0x21   :  { %185 = vpow2.f32 %v88_v14  ;;  %v98_v28 = vsel %vm97_vm3, %v93_v11, %v92_v26 }
  0x22   :  { %187 = vpow2.f32 %v94_v15 }
  0x29   :  { %v182_v16 = vpop.eup %181 }
  0x2a   :  { %v184_v17 = vpop.eup %183 }
  0x2b   :  { %v186_v18 = vpop.eup %185  ;;  %v84_v19 = vadd.f32 %v184_v17, %v182_v16 }
  0x2c   :  { %v188_v20 = vpop.eup %187 }
  0x2d   :  { %v90_v22 = vadd.f32 %v186_v18, %v84_v19 }
  0x2f   :  { %v96_v23 = vadd.f32 %v188_v20, %v90_v22 }
  0x31   :  { %189 = vlog2.f32 %v96_v23 }
  0x3b   :  { %v190_v27 = vpop.eup %189 }
  0x3c   :  { %v100_v29 = vmul.f32 0.6931472, %v190_v27 }
  0x3e   :  { %v101_v30 = vsub.f32 %v98_v28, %v100_v29 }
  0x40   :  { %v102_v31 = vmul.f32 1.442695, %v101_v30 }
  0x42   :  { %191 = vpow2.f32 %v102_v31 }
  0x4c   :  { %v192_v34 = vpop.eup %191 }
  0x4d   :  { %v105_v39 = vsub.f32 1.0, %v192_v34 }
  0x4f   :  { %v106_v40 = vmax.f32 %v105_v39, 0.0 }
  0x51   :  { %v107_v43 = vmul.f32 %v106_v40, %v106_v40 }
  0x53   :  { %v109_v44 = vmul.f32 %v108_v41, %v107_v43 }
  0x55   :  { %v110_v45 = vmul.f32 %v109_v44, %v101_v30 }
  0x57   :  { %v132_v47 = vsel %vm131_vm4, %v110_v45, 0.0 }
  0x58   :  { %v133_v48 = vadd.f32 %v132_v47, %v130_v46 }
  0x5a   :  { %134 = vst [vmem:[#allocation2] sm:$0x1] %v133_v48 }
  0x61   :  { %v138_v49 = vld [vmem:[#allocation2] sm:$0x1] }
  0x62   :  { %v140_v50 = vsel %vm139_vm5, %v138_v49, 0.0 }
  0x63   :  { %141 = vadd.xlane.f32.xlu0 %v140_v50 }
  0xf0   :  { %v142_v51 = vpop.xlane.xlu0 %141 }
  0xf1   :  { %v143_v52 = vrot.slane %v142_v51, 4 }
  0xf3   :  { %v144_v53 = vadd.f32 %v143_v52, %v142_v51 }
  0xf5   :  { %v145_v54 = vrot.slane %v144_v53, 2 }
  0xf7   :  { %v146_v55 = vadd.f32 %v145_v54, %v144_v53 }
  0xf9   :  { %v147_v56 = vrot.slane %v146_v55, 1 }
  0xfb   :  { %v148_v57 = vadd.f32 %v147_v56, %v146_v55 }
  0xfd   :  { %173 = vpush %v148_v57 }
 0x12e   :  { %s174_s25 = spop %173 }
 0x12f   :  { %v150_v58 = vstv %s174_s25 }
 0x130   :  { %152 = vst.msk [vmem:[#allocation6] sm:$0x1] %vm151_vm6, %v150_v58 }
 0x131   :  { %226 = shalt.err (!%p223_p12)
}
 0x132   :  { %s227_s30 = scalar_lea.hbm %s293_s2, 16 }
 0x133   :  { %p228_p13 = scmp.ne.s32.totalorder %s293_s2, %s227_s30  ;;  %p231_p0 = scmp.lt.u32.totalorder %s227_s30, %s293_s2 }
 0x135   :  { %p233_p1 = pnand %p231_p0, %p228_p13 }
 0x137   :  { %236 = shalt.err (!%p233_p1)
}
 0x138   :  { %162 = dma.vmem_to_hbm [thread:$0]  %s160_s24, 16, %s293_s2, [#allocation5]  }
 0x139   :  { %239 = dma.done.wait [#allocation5], 16  }
 0x13a   :  { %240 = vsyncadd [#allocation5], 4294967280 }
 0x13b   :  { %166 = vsyncpa [#allocation4], 1 }
 0x13c   :  { %167 = vsyncpa [#allocation5], 1 }

</bundles_post_ra>
